<compile_context>
chip_gen: v5e
topology: v5e:2x2
jax: 0.10.0
libtpu: 0.0.40
codegen_flags: <defaults>
</compile_context>

<pallas_src>
import jax
import jax.numpy as jnp
from jax.experimental import pallas as pl
from jax.experimental.pallas import tpu as pltpu

GAMMA = 1e-10  # RecBole-style BPRLoss gamma


def _round_up(x, m):
    return ((x + m - 1) // m) * m


def _vmem_capacity_bytes():
    """Physical VMEM of the attached TPU generation, with a safe fallback."""
    try:
        info = pltpu.get_tpu_info()
        cap = getattr(info, "vmem_capacity_bytes", None)
        if cap:
            return int(cap)
    except Exception:
        pass
    return 64 * 1024 * 1024  # conservative: v7x physical VMEM per TensorCore


def _choose_tile(batch, d_model, itemsize, vmem_cap):
    """Rows per grid step (TB).

    Sized so each step streams ~8 MiB of fresh input, the double-buffered
    working set fits comfortably in this generation's VMEM, and big batches
    keep >= ~4 grid steps (megacore + pipeline overlap).  Tiny batches get a
    single exact block (no padding, no ragged tail).
    """
    if batch <= 128:
        return int(batch)
    bytes_per_row = 3 * d_model * itemsize            # fresh input bytes / row
    tb_stream = (8 * 1024 * 1024) // max(bytes_per_row, 1)
    tb_vmem = int(vmem_cap * 0.55) // max(2 * bytes_per_row, 1)
    tb_steps = _round_up(-(-batch // 4), 128)          # keep >= ~4 grid steps
    tb = min(tb_stream, tb_vmem, tb_steps, (batch // 128) * 128)
    tb = max(128, (tb // 128) * 128)
    return int(tb)


def bpr_loss_kernel(u_ref, p_ref, n_ref, loss_ref):
    """One grid step = TB (user, pos, neg) rows.

    u_ref/p_ref/n_ref: (TB, D) gathered embedding tiles in VMEM.
    loss_ref: (1, TB) lane-dense per-row loss output tile (written once).
    """
    u = u_ref[...].astype(jnp.float32)
    diff = p_ref[...].astype(jnp.float32) - n_ref[...].astype(jnp.float32)
    # Fused pos/neg dots: sum(u*p) - sum(u*n) == sum(u*(p-n)).
    score = jnp.sum(u * diff, axis=-1)                      # (TB,)
    loss = -jnp.log(GAMMA + jax.nn.sigmoid(score))          # (TB,)
    loss_ref[...] = loss[None, :]


def bpr_forward(user_table, item_table, user_seqs, next_items, neg_items):
    """Pallas-backed BPR.forward. Returns the scalar BPR loss (f32)."""
    B = int(user_seqs.shape[0])
    D = int(user_table.shape[-1])

    # Embedding gathers in the wrapper; next_items / neg_items are 1-indexed.
    u = user_table[user_seqs]
    p = item_table[next_items - 1]
    n = item_table[neg_items - 1]

    itemsize = jnp.dtype(u.dtype).itemsize
    vmem_cap = _vmem_capacity_bytes()
    TB = _choose_tile(B, D, itemsize, vmem_cap)
    num_tiles = pl.cdiv(B, TB)

    # VMEM budget: double-buffered inputs + output + headroom, clamped below
    # this generation's physical VMEM.
    need = 2 * (3 * TB * D * itemsize + TB * 4) + (2 << 20)
    vmem_limit = int(min(max(need, 4 << 20), int(vmem_cap * 0.9)))

    in_spec = pl.BlockSpec((TB, D), lambda i: (i, 0))
    losses = pl.pallas_call(
        bpr_loss_kernel,
        out_shape=jax.ShapeDtypeStruct((1, B), jnp.float32),
        grid=(num_tiles,),
        in_specs=[in_spec, in_spec, in_spec],
        out_specs=pl.BlockSpec((1, TB), lambda i: (0, i)),
        compiler_params=pltpu.CompilerParams(
            dimension_semantics=("parallel",),   # disjoint output blocks
            vmem_limit_bytes=vmem_limit,
        ),
    )(u, p, n)

    # Final mean over exactly the real B rows (no padding exists anymore),
    # done in JAX as a pairwise reduce.
    return jnp.mean(losses[0])


def bpr_forward_ref(user_table, item_table, user_seqs, next_items, neg_items):
    """Pure-JAX reference mirroring the PyTorch module."""
    user_emb = user_table[user_seqs]
    pos_emb = item_table[next_items - 1]
    neg_emb = item_table[neg_items - 1]
    pos_scores = jnp.sum(user_emb * pos_emb, axis=-1)
    neg_scores = jnp.sum(user_emb * neg_emb, axis=-1)
    return jnp.mean(-jnp.log(GAMMA + jax.nn.sigmoid(pos_scores - neg_scores)))


if __name__ == "__main__":
    def _run_case(key, n_users, n_items, d_model, batch):
        k_user, k_item, k_u, k_p, k_n = jax.random.split(key, 5)
        # nn.Embedding default init: N(0, 1)
        user_table = jax.random.normal(k_user, (n_users, d_model), dtype=jnp.float32)
        item_table = jax.random.normal(k_item, (n_items, d_model), dtype=jnp.float32)
        user_seqs = jax.random.randint(k_u, (batch,), 0, n_users, dtype=jnp.int32)
        next_items = jax.random.randint(k_p, (batch,), 1, n_items + 1, dtype=jnp.int32)
        neg_items = jax.random.randint(k_n, (batch,), 1, n_items + 1, dtype=jnp.int32)

        loss = jax.block_until_ready(
            bpr_forward(user_table, item_table, user_seqs, next_items, neg_items))
        loss_ref = bpr_forward_ref(
            user_table, item_table, user_seqs, next_items, neg_items)
        assert jnp.allclose(loss, loss_ref, atol=1e-5, rtol=1e-5), (loss, loss_ref)

    key = jax.random.PRNGKey(0)
    k1, k2 = jax.random.split(key)
    # Small case mirroring the module's toy shapes (single exact block).
    _run_case(k1, n_users=10, n_items=50, d_model=32, batch=8)
    # Larger case: multi-step grid with a ragged final block (exercises the
    # no-padding path and store masking).
    _run_case(k2, n_users=200, n_items=500, d_model=64, batch=1000)

    print("KERNEL_OK")
</pallas_src>

<mosaic_0001>
module attributes {stable_mosaic.version = 11 : i64} {
  func.func @bpr_loss_kernel(%arg0: i32, %arg1: memref<8x32xf32, #tpu.memory_space<vmem>>, %arg2: memref<8x32xf32, #tpu.memory_space<vmem>>, %arg3: memref<8x32xf32, #tpu.memory_space<vmem>>, %arg4: memref<1x8xf32, #tpu.memory_space<vmem>>) attributes {dimension_semantics = [#tpu.dimension_semantics<parallel>], iteration_bounds = array<i64: 1>, scalar_prefetch = 0 : i64, scratch_operands = 0 : i64, tpu.core_type = #tpu.core_type<tc>, window_params = [{transform_indices = @transform_0, window_bounds = array<i64: 8, 32>}, {transform_indices = @transform_1, window_bounds = array<i64: 8, 32>}, {transform_indices = @transform_2, window_bounds = array<i64: 8, 32>}, {transform_indices = @transform_3, window_bounds = array<i64: 1, 8>}]} {
    %c0 = arith.constant 0 : index
    %c0_0 = arith.constant 0 : index
    %0 = vector.load %arg1[%c0, %c0_0] : memref<8x32xf32, #tpu.memory_space<vmem>>, vector<8x32xf32>
    %c0_1 = arith.constant 0 : index
    %c0_2 = arith.constant 0 : index
    %1 = vector.load %arg2[%c0_1, %c0_2] : memref<8x32xf32, #tpu.memory_space<vmem>>, vector<8x32xf32>
    %c0_3 = arith.constant 0 : index
    %c0_4 = arith.constant 0 : index
    %2 = vector.load %arg3[%c0_3, %c0_4] : memref<8x32xf32, #tpu.memory_space<vmem>>, vector<8x32xf32>
    %3 = arith.subf %1, %2 : vector<8x32xf32>
    %4 = arith.mulf %0, %3 : vector<8x32xf32>
    %cst = arith.constant dense<0.000000e+00> : vector<8xf32>
    %5 = vector.multi_reduction <add>, %4, %cst [1] : vector<8x32xf32> to vector<8xf32>
    %6 = arith.negf %5 : vector<8xf32>
    %7 = math.exp %6 : vector<8xf32>
    %cst_5 = arith.constant 1.000000e+00 : f32
    %8 = vector.broadcast %cst_5 : f32 to vector<8xf32>
    %9 = arith.addf %8, %7 : vector<8xf32>
    %10 = arith.divf %8, %9 : vector<8xf32>
    %cst_6 = arith.constant 1.000000e-10 : f32
    %11 = vector.broadcast %cst_6 : f32 to vector<8xf32>
    %12 = arith.addf %11, %10 : vector<8xf32>
    %13 = math.log %12 : vector<8xf32>
    %cst_7 = arith.constant 0.000000e+00 : f32
    %14 = vector.broadcast %cst_7 : f32 to vector<8xf32>
    %15 = arith.subf %14, %13 : vector<8xf32>
    %16 = vector.shape_cast %15 : vector<8xf32> to vector<1x8xf32>
    %c0_8 = arith.constant 0 : index
    %c0_9 = arith.constant 0 : index
    %17 = vector.load %arg4[%c0_8, %c0_9] : memref<1x8xf32, #tpu.memory_space<vmem>>, vector<1x8xf32>
    tpu.vector_store %arg4[%c0_8, %c0_9], %16 {strides = array<i32>} : memref<1x8xf32, #tpu.memory_space<vmem>>, vector<1x8xf32>,
    return
  }
  func.func @transform_0(%arg0: i32) -> (i32, i32) {
    %c0_i32 = arith.constant 0 : i32
    %c0_i32_0 = arith.constant 0 : i32
    return %arg0, %c0_i32 : i32, i32
  }
  func.func @transform_1(%arg0: i32) -> (i32, i32) {
    %c0_i32 = arith.constant 0 : i32
    %c0_i32_0 = arith.constant 0 : i32
    return %arg0, %c0_i32 : i32, i32
  }
  func.func @transform_2(%arg0: i32) -> (i32, i32) {
    %c0_i32 = arith.constant 0 : i32
    %c0_i32_0 = arith.constant 0 : i32
    return %arg0, %c0_i32 : i32, i32
  }
  func.func @transform_3(%arg0: i32) -> (i32, i32) {
    %c0_i32 = arith.constant 0 : i32
    %c0_i32_0 = arith.constant 0 : i32
    return %c0_i32, %arg0 : i32, i32
  }
}

</mosaic_0001>

<bundles_post_ra>
// kernel: tpu_custom_call.1
= control target key start
LH: loop header
LB: loop body
LE: loop exit
PB: predicated region body
PF: predicated region fallthrough
CT: control target
= control target key end

     0   :  { %8 = vsyncpa [#allocation3], 0  ;;  %s262_s0 = inlined_call_operand.hbm [shape: f32[8,32], index: 0, kind: input, shape index: {}]   ;;  %s263_s1 = inlined_call_operand.hbm [shape: f32[8,32], index: 1, kind: input, shape index: {}]   ;;  %s264_s2 = inlined_call_operand.hbm [shape: f32[8,32], index: 2, kind: input, shape index: {}]   ;;  %s265_s3 = inlined_call_operand.hbm [shape: f32[1,8], index: 3, kind: output, shape index: {}]  }
   0x1   :  { %9 = vsyncpa [#allocation6], 0  ;;  %s27_s14 = sshll.u32 %s263_s1, 4  ;;  %s28_s14 = int_to_ptr.hbm [resolvable:$true] %s27_s14 }
   0x2   :  { %10 = vsyncpa [#allocation4], 0  ;;  %s226_s15 = smov [#allocation5]   ;;  %s16_s19 = sshll.u32 %s262_s0, 4  ;;  %s17_s19 = int_to_ptr.hbm [resolvable:$true] %s16_s19 }
   0x3   :  { %s29_s16 = sshll.u32 %s226_s15, 4  ;;  %s227_s20 = smov [#allocation2]   ;;  %s30_s16 = int_to_ptr.vmem [resolvable:$true] %s29_s16 }
   0x4   :  { %32 = dma.hbm_to_vmem [thread:$0]  %s28_s14, 128, %s30_s16, [#allocation6]  }
   0x5   :  { %s18_s21 = sshll.u32 %s227_s20, 4  ;;  %s38_s24 = sshll.u32 %s264_s2, 4  ;;  %s19_s21 = int_to_ptr.vmem [resolvable:$true] %s18_s21  ;;  %s39_s24 = int_to_ptr.hbm [resolvable:$true] %s38_s24 }
   0x6   :  { %21 = dma.hbm_to_vmem [thread:$0]  %s17_s19, 128, %s19_s21, [#allocation3]  }
   0x7   :  { %s228_s1 = smov [#allocation7]  }
   0x8   :  { %s40_s25 = sshll.u32 %s228_s1, 4  ;;  %s41_s25 = int_to_ptr.vmem [resolvable:$true] %s40_s25 }
   0x9   :  { %43 = dma.hbm_to_vmem [thread:$0]  %s39_s24, 128, %s41_s25, [#allocation6]  }
   0xa   :  { %220 = dma.done.wait [#allocation3], 128  }
   0xb   :  { %221 = vsyncadd [#allocation3], 4294967168 }
   0xc   :  { %222 = dma.done.wait [#allocation6], 256  }
   0xd   :  { %223 = vsyncadd [#allocation6], 4294967040  ;;  %v56_v0 = vld [vmem:[#allocation2] sm:$0xff]  ;;  %v57_v1 = vld [vmem:[#allocation5] sm:$0xff]  ;;  %vm61_vm0 = vcmask 261120   ;;  %v89_v21 = vlaneseq  ;;  %s229_s0 = smov [#allocation8]  }
   0xe   :  { %v58_v2 = vld [vmem:[#allocation7] sm:$0xff]  ;;  %s100_s2 = sshll.u32 %s229_s0, 4  ;;  %s102_s28 = sshll.u32 %s265_s3, 4  ;;  %vm93_vm5 = vcmask 57344   ;;  %s101_s2 = int_to_ptr.vmem [resolvable:$true] %s100_s2  ;;  %s103_s28 = int_to_ptr.hbm [resolvable:$true] %s102_s28 }
   0xf   :  { %v59_v3 = vsub.f32 %v57_v1, %v58_v2  ;;  %v90_v24 = vand.u32 127, %v89_v21 }
  0x11   :  { %v60_v4 = vmul.f32 %v59_v3, %v56_v0 }
  0x13   :  { %v62_v5 = vsel %vm61_vm0, %v60_v4, 0.0 }
  0x14   :  { %63 = vadd.xlane.f32.xlu0 %v62_v5 }
  0x87   :  { %v64_v6 = vpop.xlane.xlu0 %63 }
  0x88   :  { %v113_v7 = vmul.f32 -1.442695, %v64_v6 }
  0x8a   :  { %118 = vpow2.f32 %v113_v7 }
  0x90   :  { %v119_v8 = vpop.eup %118 }
  0x91   :  { %v68_v9 = vadd.f32 1.0, %v119_v8 }
  0x93   :  { %120 = vrcp.f32 %v68_v9  ;;  %v80_v13 = vand.u32 2147483648, %v68_v9  ;;  %v78_v15 = vand.u32 2147483647, %v68_v9  ;;  %vm74_vm2 = vweird.f32 %v68_v9 }
  0x95   :  { %v81_v17 = vor.u32 1.1754944e-38, %v80_v13  ;;  %vm79_vm4 = vcmp.eq.f32.partialorder %v78_v15, 8.507059e+37 }
  0x99   :  { %v121_v10 = vpop.eup %120 }
  0x9a   :  { %v70_v11 = vmul.f32 %v121_v10, %v68_v9  ;;  %vm75_vm1 = vweird.f32 %v121_v10 }
  0x9b   :  { %vm76_vm3 = vmor %vm74_vm2, %vm75_vm1 }
  0x9c   :  { %v71_v12 = vsub.f32 1.0, %v70_v11 }
  0x9e   :  { %v72_v14 = vmul.f32 %v121_v10, %v71_v12 }
  0xa0   :  { %v73_v16 = vadd.f32 %v121_v10, %v72_v14 }
  0xa2   :  { %v77_v18 = vsel %vm76_vm3, %v121_v10, %v73_v16 }
  0xa3   :  { %v82_v19 = vsel %vm79_vm4, %v81_v17, %v77_v18 }
  0xa4   :  { %v84_v20 = vadd.f32 1e-10, %v82_v19 }
  0xa6   :  { %122 = vlog2.f32 %v84_v20 }
  0xac   :  { %v123_v22 = vpop.eup %122 }
  0xad   :  { %v86_v23 = vmul.f32 0.6931472, %v123_v22 }
  0xaf   :  { %v87_v25 = vsub.f32 0.0, %v86_v23 }
  0xb1   :  { %v91_v26 = vperm.slane %v87_v25, %v90_v24 }
  0xb3   :  { %94 = vst.msk [vmem:[#allocation8] sm:$0x1] %vm93_vm5, %v91_v26 }
  0xb4   :  { %105 = dma.vmem_to_hbm [thread:$0]  %s101_s2, 16, %s103_s28, [#allocation4]  }
  0xb5   :  { %224 = dma.done.wait [#allocation4], 16  }
  0xb6   :  { %225 = vsyncadd [#allocation4], 4294967280 }
  0xb7   :  { %110 = vsyncpa [#allocation3], 1 }
  0xb8   :  { %111 = vsyncpa [#allocation6], 1 }
  0xb9   :  { %112 = vsyncpa [#allocation4], 1 }

</bundles_post_ra>
